<compile_context>
chip_gen: v5e
topology: v5e:2x2
jax: 0.10.0
libtpu: 0.0.40
codegen_flags: <defaults>
</compile_context>

<pallas_src>
import math
import jax
import jax.numpy as jnp
import numpy as np
from jax.experimental import pallas as pl
from jax.experimental.pallas import tpu as pltpu

# ----- problem sizes (small, consistent with the module) -----
L = 8           # sequence length
N = 2           # batch
E = 32          # embedding_dim
H = 4           # num_heads
HEAD_DIM = E // H
HIDDEN = 64     # hidden_dim (unused by the PyTorch forward, kept for fidelity)
FF = 4 * E      # feed-forward inner width
EPS = 1e-5

_VEC_ROWS = 8               # packed vector slab rows
_FFO_ROWS = E + FF + E      # rows: W1 (E), W2 (FF), Wo (E)  -> 192


def encoder_layer_kernel(x_ref, vec_ref, wqkvb_ref, ffo_ref, out_ref):
    """One grid step == one batch element.  x_ref / out_ref: (L, E)."""
    x = x_ref[...]                                    # (L, E)

    vecs = vec_ref[...]                               # (8, 128) packed vectors
    ln1_w, ln1_b = vecs[0:1, :E], vecs[1:2, :E]
    ln2_w, ln2_b = vecs[2:3, :E], vecs[3:4, :E]
    bo, b2 = vecs[4:5, :E], vecs[5:6, :E]
    b1 = vecs[6:7, :]                                 # (1, FF)

    # ---------- LayerNorm 1 ----------
    mu = jnp.mean(x, axis=-1, keepdims=True)
    var = jnp.mean((x - mu) ** 2, axis=-1, keepdims=True)
    xn = (x - mu) * jax.lax.rsqrt(var + EPS) * ln1_w + ln1_b

    # ---------- Multi-head self-attention (q = k = v = xn) ----------
    # Heads live on the leading (batch) dim -> one batched matmul per projection.
    xb = jnp.broadcast_to(xn[None], (H, L, E))        # (H, L, E)

    def proj(wb):                                     # wb: (H, E+1, Dh), row E = bias
        w = wb[:, :E, :]                              # (H, E, Dh)
        b = wb[:, E:, :]                              # (H, 1, Dh)
        return jnp.einsum("hle,hed->hld", xb, w,
                          preferred_element_type=jnp.float32) + b

    qh = proj(wqkvb_ref[0:H]) * (1.0 / math.sqrt(HEAD_DIM))
    kh = proj(wqkvb_ref[H:2 * H])
    vh = proj(wqkvb_ref[2 * H:3 * H])

    s = jnp.einsum("hld,hmd->hlm", qh, kh, preferred_element_type=jnp.float32)
    s = s - jnp.max(s, axis=-1, keepdims=True)
    p = jnp.exp(s)
    p = p * pl.reciprocal(jnp.sum(p, axis=-1, keepdims=True), approx=True)
    o = jnp.einsum("hlm,hmd->hld", p, vh, preferred_element_type=jnp.float32)

    # Output projection done per-head and summed over heads (== concat(heads) @ Wo).
    wo_h = ffo_ref[E + FF:E + FF + E, :E].reshape(H, HEAD_DIM, E)     # (H, Dh, E)
    attn = jnp.einsum("hld,hde->hle", o, wo_h,
                      preferred_element_type=jnp.float32).sum(axis=0) + bo

    # residual 1 (dropout == identity in eval mode)
    x = x + attn

    # ---------- LayerNorm 2 ----------
    mu2 = jnp.mean(x, axis=-1, keepdims=True)
    var2 = jnp.mean((x - mu2) ** 2, axis=-1, keepdims=True)
    xn2 = (x - mu2) * jax.lax.rsqrt(var2 + EPS) * ln2_w + ln2_b

    # ---------- Feed-forward: Linear(E, 4E) -> ReLU -> Linear(4E, E) ----------
    w1 = ffo_ref[0:E, :]                              # (E, FF)  lane-dense
    w2 = ffo_ref[E:E + FF, :E]                        # (FF, E)
    h1 = jnp.maximum(jnp.dot(xn2, w1, preferred_element_type=jnp.float32) + b1, 0.0)
    ff = jnp.dot(h1, w2, preferred_element_type=jnp.float32) + b2

    # residual 2 (dropout == identity)
    out_ref[...] = x + ff


def _pack_params(p):
    """Pack the 13 parameter tensors into 3 DMA-friendly buffers."""
    # (8, 128) vector slab: one (lane-0 aligned) vector per row.
    vec = jnp.zeros((_VEC_ROWS, 128), jnp.float32)
    vec = vec.at[0, :E].set(p["ln1_w"])
    vec = vec.at[1, :E].set(p["ln1_b"])
    vec = vec.at[2, :E].set(p["ln2_w"])
    vec = vec.at[3, :E].set(p["ln2_b"])
    vec = vec.at[4, :E].set(p["out_proj_b"])
    vec = vec.at[5, :E].set(p["ff2_b"])
    vec = vec.at[6, :FF].set(p["ff1_b"])

    # Per-head Q/K/V weights with the bias appended as row E: (3*H, E+1, Dh).
    # w_h[i, h, e, d] = in_proj_w[i*E + h*Dh + d, e]   (x @ W.T convention)
    w3 = p["in_proj_w"].reshape(3, E, E)
    w_h = jnp.transpose(w3.reshape(3, H, HEAD_DIM, E), (0, 1, 3, 2))   # (3,H,E,Dh)
    b_h = p["in_proj_b"].reshape(3, H, 1, HEAD_DIM)                    # (3,H,1,Dh)
    wqkvb = jnp.concatenate([w_h, b_h], axis=2).reshape(3 * H, E + 1, HEAD_DIM)

    # (192, 128) slab: rows [0,E) = W1, [E,E+FF) = W2 (lanes 0..E), last E = Wo.
    ffo = jnp.zeros((_FFO_ROWS, 128), jnp.float32)
    ffo = ffo.at[0:E, :].set(p["ff1_w"].T)              # (E, FF)
    ffo = ffo.at[E:E + FF, :E].set(p["ff2_w"].T)        # (FF, E)
    ffo = ffo.at[E + FF:, :E].set(p["out_proj_w"].T)    # (E, E) == Wo[h*Dh+d, e]
    return vec, wqkvb, ffo


@jax.jit
def transformer_encoder_layer(x, params):
    """x: (L, N, E) float32 -> (L, N, E) float32 (seq-first, like nn.MultiheadAttention)."""
    Lx, Nx, Ex = x.shape
    vec, wqkvb, ffo = _pack_params(params)
    x_nle = jnp.transpose(x, (1, 0, 2))        # batch-major rows for the kernel grid

    out_nle = pl.pallas_call(
        encoder_layer_kernel,
        grid=(Nx,),
        in_specs=[
            pl.BlockSpec((None, Lx, Ex), lambda n: (n, 0, 0),
                         memory_space=pltpu.MemorySpace.VMEM),
            pl.BlockSpec(vec.shape, lambda n: (0, 0),
                         memory_space=pltpu.MemorySpace.VMEM),
            pl.BlockSpec(wqkvb.shape, lambda n: (0, 0, 0),
                         memory_space=pltpu.MemorySpace.VMEM),
            pl.BlockSpec(ffo.shape, lambda n: (0, 0),
                         memory_space=pltpu.MemorySpace.VMEM),
        ],
        out_specs=pl.BlockSpec((None, Lx, Ex), lambda n: (n, 0, 0),
                               memory_space=pltpu.MemorySpace.VMEM),
        out_shape=jax.ShapeDtypeStruct((Nx, Lx, Ex), jnp.float32),
        compiler_params=pltpu.CompilerParams(
            dimension_semantics=("parallel",)),
    )(x_nle, vec, wqkvb, ffo)
    return jnp.transpose(out_nle, (1, 0, 2))


# ----------------- pure-JAX reference for verification -----------------
def reference_forward(x, p):
    def ln(z, w, b):
        mu = jnp.mean(z, axis=-1, keepdims=True)
        var = jnp.mean((z - mu) ** 2, axis=-1, keepdims=True)
        return (z - mu) / jnp.sqrt(var + EPS) * w + b

    xn = ln(x, p["ln1_w"], p["ln1_b"])                          # (L, N, E)
    qkv = jnp.einsum("lne,fe->lnf", xn, p["in_proj_w"]) + p["in_proj_b"]
    q, k, v = qkv[..., :E], qkv[..., E:2 * E], qkv[..., 2 * E:]

    def split_heads(t):  # (L, N, E) -> (N, H, L, Dh)
        return jnp.transpose(t.reshape(L, N, H, HEAD_DIM), (1, 2, 0, 3))

    qh, kh, vh = split_heads(q), split_heads(k), split_heads(v)
    s = jnp.einsum("nhld,nhmd->nhlm", qh, kh) / math.sqrt(HEAD_DIM)
    pattn = jax.nn.softmax(s, axis=-1)
    o = jnp.einsum("nhlm,nhmd->nhld", pattn, vh)                # (N, H, L, Dh)
    o = jnp.transpose(o, (2, 0, 1, 3)).reshape(L, N, E)
    attn = jnp.einsum("lne,fe->lnf", o, p["out_proj_w"]) + p["out_proj_b"]
    x = x + attn

    xn2 = ln(x, p["ln2_w"], p["ln2_b"])
    h1 = jax.nn.relu(jnp.einsum("lne,fe->lnf", xn2, p["ff1_w"]) + p["ff1_b"])
    ff = jnp.einsum("lnf,ef->lne", h1, p["ff2_w"]) + p["ff2_b"]
    return x + ff


def init_params(key):
    ks = jax.random.split(key, 8)
    std = 0.05
    return {
        "ln1_w": jnp.ones((E,), jnp.float32),
        "ln1_b": jnp.zeros((E,), jnp.float32),
        "in_proj_w": std * jax.random.normal(ks[0], (3 * E, E), jnp.float32),
        "in_proj_b": std * jax.random.normal(ks[1], (3 * E,), jnp.float32),
        "out_proj_w": std * jax.random.normal(ks[2], (E, E), jnp.float32),
        "out_proj_b": std * jax.random.normal(ks[3], (E,), jnp.float32),
        "ln2_w": jnp.ones((E,), jnp.float32),
        "ln2_b": jnp.zeros((E,), jnp.float32),
        "ff1_w": std * jax.random.normal(ks[4], (FF, E), jnp.float32),
        "ff1_b": std * jax.random.normal(ks[5], (FF,), jnp.float32),
        "ff2_w": std * jax.random.normal(ks[6], (E, FF), jnp.float32),
        "ff2_b": std * jax.random.normal(ks[7], (E,), jnp.float32),
    }


if __name__ == "__main__":
    key = jax.random.PRNGKey(0)
    kx, kp = jax.random.split(key)
    x = jax.random.normal(kx, (L, N, E), jnp.float32)   # (seq, batch, embed)
    params = init_params(kp)

    out = jax.block_until_ready(transformer_encoder_layer(x, params))
    ref = jax.block_until_ready(reference_forward(x, params))
    np.testing.assert_allclose(np.asarray(out), np.asarray(ref), atol=1e-3, rtol=1e-3)

    print("KERNEL_OK")
</pallas_src>

<mosaic_0001>
module attributes {stable_mosaic.version = 11 : i64} {
  func.func @encoder_layer_kernel(%arg0: i32, %arg1: memref<1x8x32xf32, #tpu.memory_space<vmem>>, %arg2: memref<8x128xf32, #tpu.memory_space<vmem>>, %arg3: memref<12x33x8xf32, #tpu.memory_space<vmem>>, %arg4: memref<192x128xf32, #tpu.memory_space<vmem>>, %arg5: memref<1x8x32xf32, #tpu.memory_space<vmem>>) attributes {dimension_semantics = [#tpu.dimension_semantics<parallel>], iteration_bounds = array<i64: 2>, scalar_prefetch = 0 : i64, scratch_operands = 0 : i64, tpu.core_type = #tpu.core_type<tc>, window_params = [{transform_indices = @transform_0, window_bounds = array<i64: 1, 8, 32>}, {pipeline_mode = #tpu.pipeline_mode<synchronous>, transform_indices = @transform_1, window_bounds = array<i64: 8, 128>}, {pipeline_mode = #tpu.pipeline_mode<synchronous>, transform_indices = @transform_2, window_bounds = array<i64: 12, 33, 8>}, {pipeline_mode = #tpu.pipeline_mode<synchronous>, transform_indices = @transform_3, window_bounds = array<i64: 192, 128>}, {transform_indices = @transform_4, window_bounds = array<i64: 1, 8, 32>}]} {
    %c0 = arith.constant 0 : index
    %c0_0 = arith.constant 0 : index
    %c0_1 = arith.constant 0 : index
    %0 = vector.load %arg1[%c0, %c0_0, %c0_1] : memref<1x8x32xf32, #tpu.memory_space<vmem>>, vector<1x8x32xf32>
    %1 = vector.shape_cast %0 : vector<1x8x32xf32> to vector<8x32xf32>
    %c0_2 = arith.constant 0 : index
    %c0_3 = arith.constant 0 : index
    %2 = vector.load %arg2[%c0_2, %c0_3] : memref<8x128xf32, #tpu.memory_space<vmem>>, vector<8x128xf32>
    %3 = vector.extract_strided_slice %2 {offsets = [0, 0], sizes = [1, 32], strides = [1, 1]} : vector<8x128xf32> to vector<1x32xf32>
    %4 = vector.extract_strided_slice %2 {offsets = [1, 0], sizes = [1, 32], strides = [1, 1]} : vector<8x128xf32> to vector<1x32xf32>
    %5 = vector.extract_strided_slice %2 {offsets = [2, 0], sizes = [1, 32], strides = [1, 1]} : vector<8x128xf32> to vector<1x32xf32>
    %6 = vector.extract_strided_slice %2 {offsets = [3, 0], sizes = [1, 32], strides = [1, 1]} : vector<8x128xf32> to vector<1x32xf32>
    %7 = vector.extract_strided_slice %2 {offsets = [4, 0], sizes = [1, 32], strides = [1, 1]} : vector<8x128xf32> to vector<1x32xf32>
    %8 = vector.extract_strided_slice %2 {offsets = [5, 0], sizes = [1, 32], strides = [1, 1]} : vector<8x128xf32> to vector<1x32xf32>
    %9 = vector.extract_strided_slice %2 {offsets = [6, 0], sizes = [1, 128], strides = [1, 1]} : vector<8x128xf32> to vector<1x128xf32>
    %cst = arith.constant dense<0.000000e+00> : vector<8xf32>
    %10 = vector.multi_reduction <add>, %1, %cst [1] : vector<8x32xf32> to vector<8xf32>
    %11 = vector.shape_cast %10 : vector<8xf32> to vector<8x1xf32>
    %cst_4 = arith.constant 3.200000e+01 : f32
    %12 = vector.broadcast %cst_4 : f32 to vector<8x1xf32>
    %13 = arith.divf %11, %12 : vector<8x1xf32>
    %14 = vector.broadcast %13 : vector<8x1xf32> to vector<8x32xf32>
    %15 = arith.subf %1, %14 : vector<8x32xf32>
    %16 = arith.mulf %15, %15 : vector<8x32xf32>
    %cst_5 = arith.constant dense<0.000000e+00> : vector<8xf32>
    %17 = vector.multi_reduction <add>, %16, %cst_5 [1] : vector<8x32xf32> to vector<8xf32>
    %18 = vector.shape_cast %17 : vector<8xf32> to vector<8x1xf32>
    %cst_6 = arith.constant 3.200000e+01 : f32
    %19 = vector.broadcast %cst_6 : f32 to vector<8x1xf32>
    %20 = arith.divf %18, %19 : vector<8x1xf32>
    %21 = vector.broadcast %13 : vector<8x1xf32> to vector<8x32xf32>
    %22 = arith.subf %1, %21 : vector<8x32xf32>
    %cst_7 = arith.constant 9.99999974E-6 : f32
    %23 = vector.broadcast %cst_7 : f32 to vector<8x1xf32>
    %24 = arith.addf %20, %23 : vector<8x1xf32>
    %25 = math.rsqrt %24 : vector<8x1xf32>
    %26 = vector.broadcast %25 : vector<8x1xf32> to vector<8x32xf32>
    %27 = arith.mulf %22, %26 : vector<8x32xf32>
    %28 = vector.broadcast %3 : vector<1x32xf32> to vector<8x32xf32>
    %29 = arith.mulf %27, %28 : vector<8x32xf32>
    %30 = vector.broadcast %4 : vector<1x32xf32> to vector<8x32xf32>
    %31 = arith.addf %29, %30 : vector<8x32xf32>
    %32 = vector.shape_cast %31 : vector<8x32xf32> to vector<1x8x32xf32>
    %33 = vector.shape_cast %32 : vector<1x8x32xf32> to vector<1x8x32xf32>
    %34 = vector.broadcast %33 : vector<1x8x32xf32> to vector<4x8x32xf32>
    %c0_8 = arith.constant 0 : index
    %c0_9 = arith.constant 0 : index
    %c0_10 = arith.constant 0 : index
    %35 = vector.load %arg3[%c0_8, %c0_9, %c0_10] : memref<12x33x8xf32, #tpu.memory_space<vmem>>, vector<4x33x8xf32>
    %36 = vector.extract_strided_slice %35 {offsets = [0, 0, 0], sizes = [4, 32, 8], strides = [1, 1, 1]} : vector<4x33x8xf32> to vector<4x32x8xf32>
    %37 = vector.extract_strided_slice %35 {offsets = [0, 32, 0], sizes = [4, 1, 8], strides = [1, 1, 1]} : vector<4x33x8xf32> to vector<4x1x8xf32>
    "tpu.trace_start"() <{level = 10 : i32, message = "hle,hed->hld"}> : () -> ()
    %cst_11 = arith.constant dense<0.000000e+00> : vector<4x8x8xf32>
    %38 = tpu.matmul %34, %36, %cst_11 {dimension_numbers = #tpu.dot_dimension_numbers<[2], [1], [1], [2], [0, 0, 0, 1, 1, 2], [0], [0]>} : vector<4x8x32xf32>, vector<4x32x8xf32>, vector<4x8x8xf32> -> vector<4x8x8xf32>
    "tpu.trace_stop"() : () -> ()
    %39 = vector.broadcast %37 : vector<4x1x8xf32> to vector<4x8x8xf32>
    %40 = arith.addf %38, %39 : vector<4x8x8xf32>
    %cst_12 = arith.constant 0.353553385 : f32
    %41 = vector.broadcast %cst_12 : f32 to vector<4x8x8xf32>
    %42 = arith.mulf %40, %41 : vector<4x8x8xf32>
    %c4 = arith.constant 4 : index
    %c0_13 = arith.constant 0 : index
    %c0_14 = arith.constant 0 : index
    %43 = vector.load %arg3[%c4, %c0_13, %c0_14] : memref<12x33x8xf32, #tpu.memory_space<vmem>>, vector<4x33x8xf32>
    %44 = vector.extract_strided_slice %43 {offsets = [0, 0, 0], sizes = [4, 32, 8], strides = [1, 1, 1]} : vector<4x33x8xf32> to vector<4x32x8xf32>
    %45 = vector.extract_strided_slice %43 {offsets = [0, 32, 0], sizes = [4, 1, 8], strides = [1, 1, 1]} : vector<4x33x8xf32> to vector<4x1x8xf32>
    "tpu.trace_start"() <{level = 10 : i32, message = "hle,hed->hld"}> : () -> ()
    %cst_15 = arith.constant dense<0.000000e+00> : vector<4x8x8xf32>
    %46 = tpu.matmul %34, %44, %cst_15 {dimension_numbers = #tpu.dot_dimension_numbers<[2], [1], [1], [2], [0, 0, 0, 1, 1, 2], [0], [0]>} : vector<4x8x32xf32>, vector<4x32x8xf32>, vector<4x8x8xf32> -> vector<4x8x8xf32>
    "tpu.trace_stop"() : () -> ()
    %47 = vector.broadcast %45 : vector<4x1x8xf32> to vector<4x8x8xf32>
    %48 = arith.addf %46, %47 : vector<4x8x8xf32>
    %c8 = arith.constant 8 : index
    %c0_16 = arith.constant 0 : index
    %c0_17 = arith.constant 0 : index
    %49 = vector.load %arg3[%c8, %c0_16, %c0_17] : memref<12x33x8xf32, #tpu.memory_space<vmem>>, vector<4x33x8xf32>
    %50 = vector.extract_strided_slice %49 {offsets = [0, 0, 0], sizes = [4, 32, 8], strides = [1, 1, 1]} : vector<4x33x8xf32> to vector<4x32x8xf32>
    %51 = vector.extract_strided_slice %49 {offsets = [0, 32, 0], sizes = [4, 1, 8], strides = [1, 1, 1]} : vector<4x33x8xf32> to vector<4x1x8xf32>
    "tpu.trace_start"() <{level = 10 : i32, message = "hle,hed->hld"}> : () -> ()
    %cst_18 = arith.constant dense<0.000000e+00> : vector<4x8x8xf32>
    %52 = tpu.matmul %34, %50, %cst_18 {dimension_numbers = #tpu.dot_dimension_numbers<[2], [1], [1], [2], [0, 0, 0, 1, 1, 2], [0], [0]>} : vector<4x8x32xf32>, vector<4x32x8xf32>, vector<4x8x8xf32> -> vector<4x8x8xf32>
    "tpu.trace_stop"() : () -> ()
    %53 = vector.broadcast %51 : vector<4x1x8xf32> to vector<4x8x8xf32>
    %54 = arith.addf %52, %53 : vector<4x8x8xf32>
    "tpu.trace_start"() <{level = 10 : i32, message = "hld,hmd->hlm"}> : () -> ()
    %cst_19 = arith.constant dense<0.000000e+00> : vector<4x8x8xf32>
    %55 = tpu.matmul %42, %48, %cst_19 {dimension_numbers = #tpu.dot_dimension_numbers<[2], [2], [1], [1], [0, 0, 0, 1, 1, 1], [0], [0]>} : vector<4x8x8xf32>, vector<4x8x8xf32>, vector<4x8x8xf32> -> vector<4x8x8xf32>
    "tpu.trace_stop"() : () -> ()
    %cst_20 = arith.constant dense<0xFF800000> : vector<4x8xf32>
    %56 = vector.multi_reduction <maximumf>, %55, %cst_20 [2] : vector<4x8x8xf32> to vector<4x8xf32>
    %57 = vector.shape_cast %56 : vector<4x8xf32> to vector<4x8x1xf32>
    %58 = vector.broadcast %57 : vector<4x8x1xf32> to vector<4x8x8xf32>
    %59 = arith.subf %55, %58 : vector<4x8x8xf32>
    %60 = math.exp %59 : vector<4x8x8xf32>
    %cst_21 = arith.constant dense<0.000000e+00> : vector<4x8xf32>
    %61 = vector.multi_reduction <add>, %60, %cst_21 [2] : vector<4x8x8xf32> to vector<4x8xf32>
    %62 = vector.shape_cast %61 : vector<4x8xf32> to vector<4x8x1xf32>
    %63 = tpu.reciprocal %62 {approx = true} : vector<4x8x1xf32> -> vector<4x8x1xf32>
    %64 = vector.broadcast %63 : vector<4x8x1xf32> to vector<4x8x8xf32>
    %65 = arith.mulf %60, %64 : vector<4x8x8xf32>
    "tpu.trace_start"() <{level = 10 : i32, message = "hlm,hmd->hld"}> : () -> ()
    %cst_22 = arith.constant dense<0.000000e+00> : vector<4x8x8xf32>
    %66 = tpu.matmul %65, %54, %cst_22 {dimension_numbers = #tpu.dot_dimension_numbers<[2], [1], [1], [2], [0, 0, 0, 1, 1, 2], [0], [0]>} : vector<4x8x8xf32>, vector<4x8x8xf32>, vector<4x8x8xf32> -> vector<4x8x8xf32>
    "tpu.trace_stop"() : () -> ()
    %c160 = arith.constant 160 : index
    %c0_23 = arith.constant 0 : index
    %67 = vector.load %arg4[%c160, %c0_23] : memref<192x128xf32, #tpu.memory_space<vmem>>, vector<32x32xf32>
    %68 = vector.shape_cast %67 : vector<32x32xf32> to vector<4x8x32xf32>
    "tpu.trace_start"() <{level = 10 : i32, message = "hld,hde->hle"}> : () -> ()
    %cst_24 = arith.constant dense<0.000000e+00> : vector<4x8x32xf32>
    %69 = tpu.matmul %66, %68, %cst_24 {dimension_numbers = #tpu.dot_dimension_numbers<[2], [1], [1], [2], [0, 0, 0, 1, 1, 2], [0], [0]>} : vector<4x8x8xf32>, vector<4x8x32xf32>, vector<4x8x32xf32> -> vector<4x8x32xf32>
    "tpu.trace_stop"() : () -> ()
    %cst_25 = arith.constant dense<0.000000e+00> : vector<8x32xf32>
    %70 = vector.multi_reduction <add>, %69, %cst_25 [0] : vector<4x8x32xf32> to vector<8x32xf32>
    %71 = vector.broadcast %7 : vector<1x32xf32> to vector<8x32xf32>
    %72 = arith.addf %70, %71 : vector<8x32xf32>
    %73 = arith.addf %1, %72 : vector<8x32xf32>
    %cst_26 = arith.constant dense<0.000000e+00> : vector<8xf32>
    %74 = vector.multi_reduction <add>, %73, %cst_26 [1] : vector<8x32xf32> to vector<8xf32>
    %75 = vector.shape_cast %74 : vector<8xf32> to vector<8x1xf32>
    %cst_27 = arith.constant 3.200000e+01 : f32
    %76 = vector.broadcast %cst_27 : f32 to vector<8x1xf32>
    %77 = arith.divf %75, %76 : vector<8x1xf32>
    %78 = vector.broadcast %77 : vector<8x1xf32> to vector<8x32xf32>
    %79 = arith.subf %73, %78 : vector<8x32xf32>
    %80 = arith.mulf %79, %79 : vector<8x32xf32>
    %cst_28 = arith.constant dense<0.000000e+00> : vector<8xf32>
    %81 = vector.multi_reduction <add>, %80, %cst_28 [1] : vector<8x32xf32> to vector<8xf32>
    %82 = vector.shape_cast %81 : vector<8xf32> to vector<8x1xf32>
    %cst_29 = arith.constant 3.200000e+01 : f32
    %83 = vector.broadcast %cst_29 : f32 to vector<8x1xf32>
    %84 = arith.divf %82, %83 : vector<8x1xf32>
    %85 = vector.broadcast %77 : vector<8x1xf32> to vector<8x32xf32>
    %86 = arith.subf %73, %85 : vector<8x32xf32>
    %cst_30 = arith.constant 9.99999974E-6 : f32
    %87 = vector.broadcast %cst_30 : f32 to vector<8x1xf32>
    %88 = arith.addf %84, %87 : vector<8x1xf32>
    %89 = math.rsqrt %88 : vector<8x1xf32>
    %90 = vector.broadcast %89 : vector<8x1xf32> to vector<8x32xf32>
    %91 = arith.mulf %86, %90 : vector<8x32xf32>
    %92 = vector.broadcast %5 : vector<1x32xf32> to vector<8x32xf32>
    %93 = arith.mulf %91, %92 : vector<8x32xf32>
    %94 = vector.broadcast %6 : vector<1x32xf32> to vector<8x32xf32>
    %95 = arith.addf %93, %94 : vector<8x32xf32>
    %c0_31 = arith.constant 0 : index
    %c0_32 = arith.constant 0 : index
    %96 = vector.load %arg4[%c0_31, %c0_32] : memref<192x128xf32, #tpu.memory_space<vmem>>, vector<32x128xf32>
    %c32 = arith.constant 32 : index
    %c0_33 = arith.constant 0 : index
    %97 = vector.load %arg4[%c32, %c0_33] : memref<192x128xf32, #tpu.memory_space<vmem>>, vector<128x32xf32>
    %cst_34 = arith.constant dense<0.000000e+00> : vector<8x128xf32>
    %98 = tpu.matmul %95, %96, %cst_34 {dimension_numbers = #tpu.dot_dimension_numbers<[1], [0], [0], [1], [0, 0, 1, 1], [], []>} : vector<8x32xf32>, vector<32x128xf32>, vector<8x128xf32> -> vector<8x128xf32>
    %99 = vector.broadcast %9 : vector<1x128xf32> to vector<8x128xf32>
    %100 = arith.addf %98, %99 : vector<8x128xf32>
    %cst_35 = arith.constant 0.000000e+00 : f32
    %101 = vector.broadcast %cst_35 : f32 to vector<8x128xf32>
    %102 = arith.maximumf %100, %101 : vector<8x128xf32>
    %cst_36 = arith.constant dense<0.000000e+00> : vector<8x32xf32>
    %103 = tpu.matmul %102, %97, %cst_36 {dimension_numbers = #tpu.dot_dimension_numbers<[1], [0], [0], [1], [0, 0, 1, 1], [], []>} : vector<8x128xf32>, vector<128x32xf32>, vector<8x32xf32> -> vector<8x32xf32>
    %104 = vector.broadcast %8 : vector<1x32xf32> to vector<8x32xf32>
    %105 = arith.addf %103, %104 : vector<8x32xf32>
    %106 = arith.addf %73, %105 : vector<8x32xf32>
    %c0_37 = arith.constant 0 : index
    %c0_38 = arith.constant 0 : index
    %c0_39 = arith.constant 0 : index
    %107 = vector.load %arg5[%c0_37, %c0_38, %c0_39] : memref<1x8x32xf32, #tpu.memory_space<vmem>>, vector<1x8x32xf32>
    %108 = vector.shape_cast %107 : vector<1x8x32xf32> to vector<8x32xf32>
    %109 = vector.shape_cast %106 : vector<8x32xf32> to vector<1x8x32xf32>
    tpu.vector_store %arg5[%c0_37, %c0_38, %c0_39], %109 {strides = array<i32>} : memref<1x8x32xf32, #tpu.memory_space<vmem>>, vector<1x8x32xf32>,
    return
  }
  func.func @transform_0(%arg0: i32) -> (i32, i32, i32) {
    %c0_i32 = arith.constant 0 : i32
    %c0_i32_0 = arith.constant 0 : i32
    %c0_i32_1 = arith.constant 0 : i32
    return %arg0, %c0_i32, %c0_i32_0 : i32, i32, i32
  }
  func.func @transform_1(%arg0: i32) -> (i32, i32) {
    %c0_i32 = arith.constant 0 : i32
    %c0_i32_0 = arith.constant 0 : i32
    %c0_i32_1 = arith.constant 0 : i32
    return %c0_i32, %c0_i32_0 : i32, i32
  }
  func.func @transform_2(%arg0: i32) -> (i32, i32, i32) {
    %c0_i32 = arith.constant 0 : i32
    %c0_i32_0 = arith.constant 0 : i32
    %c0_i32_1 = arith.constant 0 : i32
    %c0_i32_2 = arith.constant 0 : i32
    return %c0_i32, %c0_i32_0, %c0_i32_1 : i32, i32, i32
  }
  func.func @transform_3(%arg0: i32) -> (i32, i32) {
    %c0_i32 = arith.constant 0 : i32
    %c0_i32_0 = arith.constant 0 : i32
    %c0_i32_1 = arith.constant 0 : i32
    return %c0_i32, %c0_i32_0 : i32, i32
  }
  func.func @transform_4(%arg0: i32) -> (i32, i32, i32) {
    %c0_i32 = arith.constant 0 : i32
    %c0_i32_0 = arith.constant 0 : i32
    %c0_i32_1 = arith.constant 0 : i32
    return %arg0, %c0_i32, %c0_i32_0 : i32, i32, i32
  }
}

</mosaic_0001>

<bundles_post_ra>
// kernel: transformer_encoder_layer.1
= control target key start
LH: loop header
LB: loop body
LE: loop exit
PB: predicated region body
PF: predicated region fallthrough
CT: control target
= control target key end

     0   :  { %s1199_s15 = smov 0   ;;  %s1554_s0 = inlined_call_operand.vmem [shape: f32[2,8,32], index: 0, kind: input, shape index: {}]   ;;  %s1555_s1 = inlined_call_operand.vmem [shape: f32[8,128], index: 1, kind: input, shape index: {}]   ;;  %s1556_s2 = inlined_call_operand.vmem [shape: f32[12,33,8], index: 2, kind: input, shape index: {}]   ;;  %s1557_s3 = inlined_call_operand.vmem [shape: f32[192,128], index: 3, kind: input, shape index: {}]   ;;  %s1558_s4 = inlined_call_operand.vmem [shape: f32[2,8,32], index: 4, kind: output, shape index: {}]  }
   0x1 LB: > { %s1044_s16 = sadd.s32 4294967295, %s1171_s15   ;;  %p1048_p0 = scmp.ge.s32.totalorder %s1171_s15, 1  ;;  %s1171_s15 = sphi %s1199_s15, %s14_s15  }
   0x2   : > { %p161_p1 = scmp.lt.s32.totalorder %s1171_s15, 3 }
   0x4   : > { %p162_p2 = pnand %p1048_p0, %p161_p1 }
   0x5   : > { %p185_p3 = scmp.lt.s32.totalorder (!%p162_p2), %s1044_s16, 1 }
   0x6   : > { %165 = sbr.rel (%p162_p2) target bundleno = 1630 (0x65e), region = 36 }
   0xb   : > { %s1560_s16 = smov (!%p185_p3, %s1044_s16), 1  ;;  %vm195_vm0 = vcmask 261120   ;;  %v1173_v2 = vmov 32.0   ;;  %v232_v14 = vld [vmem:[%s1556_s2 + $0x18] sm:$0xff]  ;;  %v237_v15 = vld [vmem:[%s1556_s2 + $0x40] sm:$0xff]  ;;  %v247_v16 = vld [vmem:[%s1556_s2 + $0x90] sm:$0xff] }
   0xc   : > { %s1049_s17 = sshll.u32 %s1560_s16, 3  ;;  %1143 = vrcp.f32 %v1173_v2  ;;  %268 = vmatpush.msra.mxu0 %v232_v14  ;;  %288 = vmatpush.msra.mxu2 %v237_v15  ;;  %v1087_v17 = vld [vmem:[%s1556_s2 + $0x180] sm:$0xff]  ;;  %v231_v18 = vld [vmem:[%s1556_s2 + $0x10] sm:$0xff]  ;;  %v236_v19 = vld [vmem:[%s1556_s2 + $0x38] sm:$0xff]  ;;  %vm550_vm5 = vcmask 64512  }
   0xd   : > { %s188_s20 = scalar_lea.vmem %s1554_s0, %s1049_s17  ;;  %328 = vmatpush.msra.mxu3 %v247_v16  ;;  %502 = vmatpush.msra.mxu1 %v1087_v17  ;;  %v246_v20 = vld [vmem:[%s1556_s2 + $0x88] sm:$0xff]  ;;  %v1086_v21 = vld [vmem:[%s1556_s2 + $0x178] sm:$0xff]  ;;  %v235_v23 = vld [vmem:[%s1556_s2 + $0x30] sm:$0xff]  ;;  %s192_s6 = scalar_lea.vmem %s1558_s4, %s1049_s17 }
   0xe   : > { %v1215_v0 = vld [vmem:[%s188_s20] sm:$0xff]  ;;  %269 = vmatpush.msra.mxu0 %v231_v18  ;;  %289 = vmatpush.msra.mxu2 %v236_v19  ;;  %v230_v22 = vld [vmem:[%s1556_s2 + $0x8] sm:$0xff]  ;;  %v1085_v25 = vld [vmem:[%s1556_s2 + $0x170] sm:$0xff] }
   0xf   : > { %v196_v1 = vsel %vm195_vm0, %v1215_v0, 0.0  ;;  %329 = vmatpush.msra.mxu3 %v246_v20  ;;  %503 = vmatpush.msra.mxu1 %v1086_v21  ;;  %v245_v24 = vld [vmem:[%s1556_s2 + $0x80] sm:$0xff]  ;;  %v234_v27 = vld [vmem:[%s1556_s2 + $0x28] sm:$0xff]  ;;  %v244_v28 = vld [vmem:[%s1556_s2 + $0x78] sm:$0xff] }
  0x10   : > { %197 = vadd.xlane.f32.xlu0 %v196_v1  ;;  %270 = vmatpush.msra.mxu0 %v230_v22  ;;  %v229_v26 = vld [vmem:[%s1556_s2] sm:$0xff]  ;;  %v1084_v29 = vld [vmem:[%s1556_s2 + $0x168] sm:$0xff]  ;;  %v1058_v31 = vld [vmem:[%s1556_s2 + $0xb8] sm:$0xff] }
  0x11   : > { %290 = vmatpush.msra.mxu2 %v235_v23  ;;  %330 = vmatpush.msra.mxu3 %v245_v24  ;;  %v242_v30 = vld [vmem:[%s1556_s2 + $0x68] sm:$0xff]  ;;  %v1063_v32 = vld [vmem:[%s1556_s2 + $0xe0] sm:$0xff]  ;;  %v1057_v34 = vld [vmem:[%s1556_s2 + $0xb0] sm:$0xff] }
  0x12   : > { %v1144_v3 = vpop.eup %1143  ;;  %504 = vmatpush.msra.mxu1 %v1085_v25  ;;  %271 = vmatpush.msra.mxu0 %v229_v26  ;;  %v241_v33 = vld [vmem:[%s1556_s2 + $0x60] sm:$0xff]  ;;  %v1062_v35 = vld [vmem:[%s1556_s2 + $0xd8] sm:$0xff]  ;;  %v1056_v38 = vld [vmem:[%s1556_s2 + $0xa8] sm:$0xff] }
  0x13   : > { %v200_v4 = vmul.f32 32.0, %v1144_v3  ;;  %vm204_vm1 = vweird.f32 %v1144_v3  ;;  %291 = vmatpush.msra.mxu2 %v234_v27  ;;  %331 = vmatpush.msra.mxu3 %v244_v28  ;;  %v240_v37 = vld [vmem:[%s1556_s2 + $0x58] sm:$0xff]  ;;  %v1061_v40 = vld [vmem:[%s1556_s2 + $0xd0] sm:$0xff]  ;;  %v1055_v42 = vld [vmem:[%s1556_s2 + $0xa0] sm:$0xff] }
  0x14   : > { %505 = vmatpush.msra.mxu1 %v1084_v29  ;;  %377 = vmatpush.msrb.mxu0 %v1058_v31  ;;  %v239_v41 = vld [vmem:[%s1556_s2 + $0x50] sm:$0xff]  ;;  %v1060_v44 = vld [vmem:[%s1556_s2 + $0xc8] sm:$0xff]  ;;  %v1316_v49 = vld [vmem:[%s1555_s1] sm:$0xff] }
  0x15   : > { %v201_v5 = vsub.f32 1.0, %v200_v4  ;;  %308 = vmatpush.msrb.mxu2 %v242_v30  ;;  %397 = vmatpush.msrb.mxu3 %v1063_v32  ;;  %v225_v52 = vperm.slane %v1316_v49, 0  ;;  %v227_v54 = vperm.slane %v1316_v49, 1  ;;  %v1068_v58 = vld [vmem:[%s1556_s2 + $0x108] sm:$0xff]  ;;  %v1073_v59 = vld [vmem:[%s1556_s2 + $0x130] sm:$0xff]  ;;  %v1082_v60 = vld [vmem:[%s1556_s2 + $0x158] sm:$0xff] }
  0x16   : > { %378 = vmatpush.msrb.mxu0 %v1057_v34  ;;  %v1067_v61 = vld [vmem:[%s1556_s2 + $0x100] sm:$0xff]  ;;  %v1072_v62 = vld [vmem:[%s1556_s2 + $0x128] sm:$0xff]  ;;  %v1081_v63 = vld [vmem:[%s1556_s2 + $0x150] sm:$0xff] }
  0x17   : > { %v202_v6 = vmul.f32 %v1144_v3, %v201_v5  ;;  %309 = vmatpush.msrb.mxu2 %v241_v33  ;;  %398 = vmatpush.msrb.mxu3 %v1062_v35  ;;  %v1066_v1 = vld [vmem:[%s1556_s2 + $0xf8] sm:$0xff]  ;;  %v1071_v2 = vld [vmem:[%s1556_s2 + $0x120] sm:$0xff]  ;;  %v1065_v4 = vld [vmem:[%s1556_s2 + $0xf0] sm:$0xff] }
  0x18   : > { %379 = vmatpush.msrb.mxu0 %v1056_v38  ;;  %v1070_v5 = vld [vmem:[%s1556_s2 + $0x118] sm:$0xff]  ;;  %v1089_v14 = vld [vmem:[%s1556_s2 + $0x190] sm:$0xff]  ;;  %v1131_v17 = vld [vmem:[%s1556_s2 + $0x20] ss:$0 sm:$0xff] }
  0x19   : > { %v203_v7 = vadd.f32 %v1144_v3, %v202_v6  ;;  %310 = vmatpush.msrb.mxu2 %v240_v37  ;;  %399 = vmatpush.msrb.mxu3 %v1061_v40  ;;  %v1079_v6 = vld [vmem:[%s1556_s2 + $0x140] sm:$0xff]  ;;  %v1094_v15 = vld [vmem:[%s1556_s2 + $0x1b8] sm:$0xff]  ;;  %v1133_v24 = vld [vmem:[%s1556_s2 + $0x48] ss:$0 sm:$0xff] }
  0x1a   : > { %380 = vmatpush.msrb.mxu0 %v1055_v42  ;;  %v1135_v18 = vld [vmem:[%s1556_s2 + $0xc0] ss:$0 sm:$0xff]  ;;  %v1137_v26 = vld [vmem:[%s1556_s2 + $0xe8] ss:$0 sm:$0xff]  ;;  %v1136_v37 = vld [vmem:[%s1556_s2 + $0x70] ss:$0 sm:$0xff] }
  0x1b   : > { %v1219_v8 = vsel %vm204_vm1, %v1144_v3, %v203_v7  ;;  %311 = vmatpush.msrb.mxu2 %v239_v41  ;;  %400 = vmatpush.msrb.mxu3 %v1060_v44  ;;  %v1080_v3 = vld [vmem:[%s1556_s2 + $0x148] sm:$0xff]  ;;  %v1138_v28 = vld [vmem:[%s1556_s2 + $0x160] ss:$0 sm:$0xff]  ;;  %v1139_v40 = vld [vmem:[%s1556_s2 + $0x110] ss:$0 sm:$0xff] }
  0x1c   : > { %v1092_v7 = vld [vmem:[%s1556_s2 + $0x1a8] sm:$0xff]  ;;  %v1140_v41 = vld [vmem:[%s1556_s2 + $0x138] ss:$0 sm:$0xff] }
  0x1d   : > { %v1132_v27 = vld [vmem:[%s1556_s2 + $0x188] ss:$0 sm:$0xff] }
  0x83   : > { %v198_v9 = vpop.xlane.xlu0 %197 }
  0x84   : > { %v206_v10 = vmul.f32 %v1219_v8, %v198_v9  ;;  %v1097_v9 = vld [vmem:[%s1556_s2 + $0x1d0] sm:$0xff] }
  0x86   : > { %v1223_v11 = vsub.f32 %v1215_v0, %v206_v10  ;;  %v1091_v10 = vld [vmem:[%s1556_s2 + $0x1a0] sm:$0xff] }
  0x88   : > { %v208_v12 = vmul.f32 %v1223_v11, %v1223_v11 }
  0x8a   : > { %v209_v13 = vsel %vm195_vm0, %v208_v12, 0.0  ;;  %v1090_v12 = vld [vmem:[%s1556_s2 + $0x198] sm:$0xff] }
  0x8b   : > { %210 = vadd.xlane.f32.xlu0 %v209_v13  ;;  %v1095_v13 = vld [vmem:[%s1556_s2 + $0x1c0] sm:$0xff] }
  0xfe   : > { %v211_v36 = vpop.xlane.xlu0 %210 }
  0xff   : > { %v212_v39 = vmul.f32 %v211_v36, %v1219_v8 }
 0x101   : > { %v213_v43 = vadd.f32 1e-05, %v212_v39  ;;  %v1134_v39 = vld [vmem:[%s1556_s2 + $0x98] ss:$0 sm:$0xff] }
 0x103   : > { %1145 = vrsqrt.f32 %v213_v43  ;;  %vm220_vm3 = vweird.f32 %v213_v43 }
 0x109   : > { %v1146_v45 = vpop.eup %1145 }
 0x10a   : > { %v215_v46 = vmul.f32 %v1146_v45, %v213_v43  ;;  %vm221_vm2 = vweird.f32 %v1146_v45 }
 0x10b   : > { %vm222_vm4 = vmor %vm220_vm3, %vm221_vm2 }
 0x10c   : > { %v216_v47 = vmul.f32 %v1146_v45, %v215_v46 }
 0x10e   : > { %v217_v48 = vmul.f32 0.5, %v216_v47 }
 0x110   : > { %v218_v50 = vsub.f32 1.5, %v217_v48 }
 0x112   : > { %v219_v51 = vmul.f32 %v1146_v45, %v218_v50 }
 0x114   : > { %v223_v53 = vsel %vm222_vm4, %v1146_v45, %v219_v51  ;;  %v1141_v51 = vld [vmem:[%s1556_s2 + $0x1b0] ss:$0 sm:$0xff] }
 0x115   : > { %v224_v55 = vmul.f32 %v223_v53, %v1223_v11  ;;  %v1096_v11 = vld [vmem:[%s1556_s2 + $0x1c8] sm:$0xff] }
 0x117   : > { %v226_v56 = vmul.f32 %v225_v52, %v224_v55  ;;  %v1142_v52 = vld [vmem:[%s1556_s2 + $0x1d8] ss:$0 sm:$0xff] }
 0x119   : > { %v228_v57 = vadd.f32 %v227_v54, %v226_v56 }
 0x11b   : > { %1051 = vmatmul.msk.f32.vlgmr.msra.gmra.mxu0 %vm195_vm0, %v228_v57  ;;  %1052 = vmatmul.msk.f32.vlgmr.msra.gmra.mxu2 %vm195_vm0, %v228_v57 }
 0x11c   : > { %1054 = vmatmul.msk.f32.vlgmr.msra.gmra.mxu3 %vm195_vm0, %v228_v57  ;;  %1100 = vmatmul.msk.f32.vlgmr.msra.gmra.mxu1 %vm195_vm0, %v228_v57 }
 0x11d   : > { %417 = vmatpush.msra.mxu2 %v1068_v58  ;;  %437 = vmatpush.msra.mxu3 %v1073_v59 }
 0x11e   : > { %482 = vmatpush.msra.mxu0 %v1082_v60 }
 0x11f   : > { %418 = vmatpush.msra.mxu2 %v1067_v61  ;;  %438 = vmatpush.msra.mxu3 %v1072_v62 }
 0x120   : > { %483 = vmatpush.msra.mxu0 %v1081_v63 }
 0x121   : > { %419 = vmatpush.msra.mxu2 %v1066_v1  ;;  %439 = vmatpush.msra.mxu3 %v1071_v2 }
 0x122   : > { %484 = vmatpush.msra.mxu0 %v1080_v3 }
 0x123   : > { %1053 = vmatmul.msk.f32.vlgmr.msrb.gmra.mxu2 %vm195_vm0, %v228_v57  ;;  %1075 = vmatmul.msk.f32.vlgmr.msrb.gmra.mxu0 %vm195_vm0, %v228_v57 }
 0x124   : > { %1076 = vmatmul.msk.f32.vlgmr.msrb.gmra.mxu3 %vm195_vm0, %v228_v57  ;;  %420 = vmatpush.msra.mxu2 %v1065_v4 }
 0x125   : > { %440 = vmatpush.msra.mxu3 %v1070_v5  ;;  %485 = vmatpush.msra.mxu0 %v1079_v6 }
 0x126   : > { %522 = vmatpush.msrb.mxu2 %v1092_v7 }
 0x127   : > { %542 = vmatpush.msrb.mxu3 %v1097_v9 }
 0x128   : > { %523 = vmatpush.msrb.mxu2 %v1091_v10 }
 0x129   : > { %543 = vmatpush.msrb.mxu3 %v1096_v11 }
 0x12a   : > { %524 = vmatpush.msrb.mxu2 %v1090_v12 }
 0x12b   : > { %544 = vmatpush.msrb.mxu3 %v1095_v13  ;;  %1077 = vmatmul.msk.f32.vlgmr.msra.gmra.mxu2 %vm195_vm0, %v228_v57 }
 0x12c   : > { %1099 = vmatmul.msk.f32.vlgmr.msra.gmra.mxu0 %vm195_vm0, %v228_v57  ;;  %1078 = vmatmul.msk.f32.vlgmr.msra.gmra.mxu3 %vm195_vm0, %v228_v57 }
 0x12d   : > { %525 = vmatpush.msrb.mxu2 %v1089_v14  ;;  %545 = vmatpush.msrb.mxu3 %v1094_v15 }
 0x133   : > { %1101 = vmatmul.msk.f32.vlgmr.msrb.gmra.mxu2 %vm195_vm0, %v228_v57 }
 0x134   : > { %1102 = vmatmul.msk.f32.vlgmr.msrb.gmra.mxu3 %vm195_vm0, %v228_v57 }
 0x198   : > { %v273_v16 = vpop.f32.mrf.mxu0 }
 0x199   : > { %v274_v21 = vadd.f32 %v1131_v17, %v273_v16  ;;  %v507_v29 = vpop.f32.mrf.mxu1 }
 0x19a   : > { %v508_v35 = vadd.f32 %v1132_v27, %v507_v29 }
 0x19b   : > { %v336_v25 = vmul.f32 0.35355338, %v274_v21 }
 0x19e   : > { %v293_v19 = vpop.f32.mrf.mxu2 }
 0x19f   : > { %v333_v20 = vpop.f32.mrf.mxu3  ;;  %v294_v31 = vadd.f32 %v1133_v24, %v293_v19 }
 0x1a0   : > { %v382_v22 = vpop.f32.mrf.mxu0  ;;  %v334_v44 = vadd.f32 %v1134_v39, %v333_v20 }
 0x1a1   : > { %v383_v23 = vadd.f32 %v1135_v18, %v382_v22  ;;  %v337_v38 = vmul.f32 0.35355338, %v294_v31 }
 0x1a2   : > { %v339_v50 = vmul.f32 0.35355338, %v334_v44 }
 0x1a3   : > { %1103 = vmatpush.xpose.msk.msrb.mxu0 %vm550_vm5, %v383_v23 }
 0x1a6   : > { %v313_v30 = vpop.f32.mrf.mxu2  ;;  %1104 = vmatmul.msk.f32.vlgmr.msrb.gmra.mxu0 %vm550_vm5, %v336_v25 }
 0x1a7   : > { %v402_v32 = vpop.f32.mrf.mxu3  ;;  %v314_v42 = vadd.f32 %v1136_v37, %v313_v30  ;;  %v792_v37 = vld [vmem:[%s1557_s3 + $0xa8] sm:$0xff] }
 0x1a8   : > { %v403_v33 = vadd.f32 %v1137_v26, %v402_v32 }
 0x1a9   : > { %v487_v34 = vpop.f32.mrf.mxu0  ;;  %v338_v48 = vmul.f32 0.35355338, %v314_v42 }
 0x1aa   : > { %v488_v36 = vadd.f32 %v1138_v28, %v487_v34  ;;  %1105 = vmatpush.xpose.msk.msrb.mxu1 %vm550_vm5, %v403_v33 }
 0x1ac   : > { %717 = vmatpush.msra.mxu0 %v488_v36  ;;  %v793_v36 = vld [vmem:[%s1557_s3 + $0xb0] sm:$0xff] }
 0x1ad   : > { %1106 = vmatmul.msk.f32.vlgmr.msrb.gmra.mxu1 %vm550_vm5, %v337_v38  ;;  %v794_v38 = vld [vmem:[%s1557_s3 + $0xb8] sm:$0xff] }
 0x1ae   : > { %740 = vmatpush.msra.mxu1 %v508_v35  ;;  %v422_v43 = vpop.f32.mrf.mxu2  ;;  %v791_v35 = vld [vmem:[%s1557_s3 + $0xa0] sm:$0xff] }
 0x1af   : > { %v423_v45 = vadd.f32 %v1139_v40, %v422_v43  ;;  %v442_v46 = vpop.f32.mrf.mxu3  ;;  %813 = vmatpush.msrb.mxu0 %v791_v35  ;;  %v943_v35 = vperm.slane %v1316_v49, 6 }
 0x1b0   : > { %v443_v47 = vadd.f32 %v1140_v41, %v442_v46  ;;  %836 = vmatpush.msrb.mxu1 %v792_v37 }
 0x1b1   : > { %1107 = vmatpush.xpose.msk.msra.mxu2 %vm550_vm5, %v423_v45 }
 0x1b2   : > { %1109 = vmatpush.xpose.msk.msra.mxu3 %vm550_vm5, %v443_v47 }
 0x1b4   : > { %1108 = vmatmul.msk.f32.vlgmr.msra.gmra.mxu2 %vm550_vm5, %v338_v48 }
 0x1b5   : > { %1110 = vmatmul.msk.f32.vlgmr.msra.gmra.mxu3 %vm550_vm5, %v339_v50 }
 0x1b6   : > { %v527_v53 = vpop.f32.mrf.mxu2 }
 0x1b7   : > { %v528_v54 = vadd.f32 %v1141_v51, %v527_v53  ;;  %v547_v55 = vpop.f32.mrf.mxu3  ;;  %v894_v53 = vperm.slane %v1316_v49, 4 }
 0x1b8   : > { %v548_v56 = vadd.f32 %v1142_v52, %v547_v55 }
 0x1b9   : > { %763 = vmatpush.msrb.mxu2 %v528_v54 }
 0x1ba   : > { %786 = vmatpush.msrb.mxu3 %v548_v56 }
 0x1bb   : > { %859 = vmatpush.msra.mxu2 %v793_v36 }
 0x1bc   : > { %882 = vmatpush.msra.mxu3 %v794_v38 }
 0x223   : > { %v574_v57 = vpop.f32.mrf.mxu0 }
 0x224   : > { %v655_v58 = vsel %vm550_vm5, %v574_v57, -inf }
 0x225   : > { %656 = vmax.xlane.f32.xlu2 %v655_v58 }
 0x22a   : > { %v600_v59 = vpop.f32.mrf.mxu1 }
 0x22b   : > { %v658_v60 = vsel %vm550_vm5, %v600_v59, -inf }
 0x22d   : > { %659 = vmax.xlane.f32.xlu2 %v658_v60 }
 0x237   : > { %v626_v61 = vpop.f32.mrf.mxu2 }
 0x238   : > { %v661_v62 = vsel %vm550_vm5, %v626_v61, -inf  ;;  %v652_v63 = vpop.f32.mrf.mxu3 }
 0x239   : > { %662 = vmax.xlane.f32.xlu1 %v661_v62  ;;  %v664_v1 = vsel %vm550_vm5, %v652_v63, -inf }
 0x241   : > { %665 = vmax.xlane.f32.xlu1 %v664_v1  ;;  %v926_v1 = vld [vmem:[%s1557_s3 + $0x18] sm:$0xff] }
 0x298   : > { %v657_v2 = vpop.xlane.xlu2 %656 }
 0x299   : > { %v667_v3 = vsub.f32 %v574_v57, %v657_v2  ;;  %v924_v2 = vld [vmem:[%s1557_s3 + $0x8] sm:$0xff] }
 0x29b   : > { %v671_v4 = vmul.f32 1.442695, %v667_v3  ;;  %v923_v3 = vld [vmem:[%s1557_s3] sm:$0xff] }
 0x29d   : > { %1147 = vpow2.f32 %v671_v4  ;;  %v942_v4 = vld [vmem:[%s1557_s3 + $0x98] sm:$0xff] }
 0x2a0   : > { %v660_v7 = vpop.xlane.xlu2 %659 }
 0x2a1   : > { %v668_v11 = vsub.f32 %v600_v59, %v660_v7 }
 0x2a3   : > { %v1148_v5 = vpop.eup %1147  ;;  %v673_v13 = vmul.f32 1.442695, %v668_v11 }
 0x2a4   : > { %v679_v6 = vsel %vm550_vm5, %v1148_v5, 0.0 }
 0x2a5   : > { %680 = vadd.xlane.f32.xlu2 %v679_v6  ;;  %v940_v6 = vld [vmem:[%s1557_s3 + $0x88] sm:$0xff] }
 0x2ac   : > { %v663_v9 = vpop.xlane.xlu1 %662 }
 0x2ad   : > { %v669_v10 = vsub.f32 %v626_v61, %v663_v9 }
 0x2af   : > { %v675_v12 = vmul.f32 1.442695, %v669_v10  ;;  %v939_v10 = vld [vmem:[%s1557_s3 + $0x80] sm:$0xff] }
 0x2b1   : > { %1149 = vpow2.f32 %v675_v12  ;;  %v938_v12 = vld [vmem:[%s1557_s3 + $0x78] sm:$0xff] }
 0x2b2   : > { %1151 = vpow2.f32 %v673_v13  ;;  %v937_v13 = vld [vmem:[%s1557_s3 + $0x70] sm:$0xff] }
 0x2b4   : > { %v666_v14 = vpop.xlane.xlu1 %665 }
 0x2b5   : > { %v670_v15 = vsub.f32 %v652_v63, %v666_v14  ;;  %v935_v14 = vld [vmem:[%s1557_s3 + $0x60] sm:$0xff] }
 0x2b7   : > { %v1150_v16 = vpop.eup %1149  ;;  %v677_v17 = vmul.f32 1.442695, %v670_v15 }
 0x2b8   : > { %v685_v18 = vsel %vm550_vm5, %v1150_v16, 0.0  ;;  %v1152_v19 = vpop.eup %1151 }
 0x2b9   : > { %1153 = vpow2.f32 %v677_v17  ;;  %686 = vadd.xlane.f32.xlu0 %v685_v18  ;;  %v682_v22 = vsel %vm550_vm5, %v1152_v19, 0.0  ;;  %v933_v18 = vld [vmem:[%s1557_s3 + $0x50] sm:$0xff] }
 0x2bf   : > { %v1154_v20 = vpop.eup %1153 }
 0x2c0   : > { %v688_v21 = vsel %vm550_vm5, %v1154_v20, 0.0 }
 0x2c1   : > { %689 = vadd.xlane.f32.xlu1 %v688_v21  ;;  %683 = vadd.xlane.f32.xlu0 %v682_v22  ;;  %v931_v22 = vld [vmem:[%s1557_s3 + $0x40] sm:$0xff] }
 0x318   : > { %v681_v23 = vpop.xlane.xlu2 %680 }
 0x319   : > { %1155 = vrcp.f32 %v681_v23 }
 0x31f   : > { %v1156_v24 = vpop.eup %1155 }
 0x320   : > { %v695_v25 = vmul.f32 %v1156_v24, %v1148_v5  ;;  %v941_v5 = vld [vmem:[%s1557_s3 + $0x90] sm:$0xff]  ;;  %v930_v24 = vld [vmem:[%s1557_s3 + $0x38] sm:$0xff] }
 0x322   : > { %1111 = vmatmul.msk.f32.vlgmr.msra.gmra.mxu0 %vm550_vm5, %v695_v25 }
 0x323   : > { %959 = vmatpush.msra.mxu0 %v926_v1 }
 0x32c   : > { %v687_v26 = vpop.xlane.xlu0 %686 }
 0x32d   : > { %1157 = vrcp.f32 %v687_v26  ;;  %v919_v26 = vperm.slane %v1316_v49, 2 }
 0x333   : > { %v1158_v27 = vpop.eup %1157 }
 0x334   : > { %v697_v28 = vmul.f32 %v1158_v27, %v1150_v16  ;;  %v690_v29 = vpop.xlane.xlu1 %689  ;;  %v684_v30 = vpop.xlane.xlu0 %683  ;;  %v934_v16 = vld [vmem:[%s1557_s3 + $0x58] sm:$0xff] }
 0x335   : > { %1159 = vrcp.f32 %v690_v29  ;;  %v921_v29 = vperm.slane %v1316_v49, 3 }
 0x336   : > { %1161 = vrcp.f32 %v684_v30  ;;  %1113 = vmatmul.msk.f32.vlgmr.msrb.gmra.mxu2 %vm550_vm5, %v697_v28 }
 0x33b   : > { %v1160_v31 = vpop.eup %1159 }
 0x33c   : > { %v1162_v32 = vpop.eup %1161  ;;  %v698_v33 = vmul.f32 %v1160_v31, %v1154_v20  ;;  %v932_v20 = vld [vmem:[%s1557_s3 + $0x48] sm:$0xff] }
 0x33d   : > { %v696_v34 = vmul.f32 %v1162_v32, %v1152_v19  ;;  %v929_v32 = vld [vmem:[%s1557_s3 + $0x30] sm:$0xff] }
 0x33e   : > { %1114 = vmatmul.msk.f32.vlgmr.msrb.gmra.mxu3 %vm550_vm5, %v698_v33  ;;  %v928_v33 = vld [vmem:[%s1557_s3 + $0x28] sm:$0xff] }
 0x33f   : > { %1112 = vmatmul.msk.f32.vlgmr.msra.gmra.mxu1 %vm550_vm5, %v696_v34  ;;  %v927_v34 = vld [vmem:[%s1557_s3 + $0x20] sm:$0xff] }
 0x340   : > { %969 = vmatpush.msra.mxu1 %v942_v4 }
 0x342   : > { %970 = vmatpush.msra.mxu1 %v941_v5 }
 0x344   : > { %971 = vmatpush.msra.mxu1 %v940_v6 }
 0x346   : > { %972 = vmatpush.msra.mxu1 %v939_v10 }
 0x348   : > { %973 = vmatpush.msra.mxu1 %v938_v12 }
 0x34a   : > { %974 = vmatpush.msra.mxu1 %v937_v13 }
 0x39f   : > { %v719_v39 = vpop.f32.mrf.mxu0 }
 0x3a0   : > { %1115 = vmatmul.msk.f32.vlgmr.msrb.gmra.mxu0 %vm550_vm5, %v719_v39  ;;  %v968_v39 = vperm.slane %v1316_v49, 5 }
 0x3b9   : > { %v765_v40 = vpop.f32.mrf.mxu2 }
 0x3ba   : > { %1117 = vmatmul.msk.f32.vlgmr.msra.gmra.mxu2 %vm550_vm5, %v765_v40 }
 0x3bc   : > { %v742_v41 = vpop.f32.mrf.mxu1 }
 0x3bd   : > { %1116 = vmatmul.msk.f32.vlgmr.msrb.gmra.mxu1 %vm550_vm5, %v742_v41 }
 0x3c1   : > { %v788_v42 = vpop.f32.mrf.mxu3 }
 0x3c2   : > { %1118 = vmatmul.msk.f32.vlgmr.msra.gmra.mxu3 %vm550_vm5, %v788_v42 }
 0x41d   : > { %v815_v44 = vpop.f32.mrf.mxu0 }
 0x41e   : > { %v887_v47 = vsel %vm195_vm0, %v815_v44, 0.0 }
 0x43a   : > { %v838_v43 = vpop.f32.mrf.mxu1 }
 0x43b   : > { %v888_v46 = vsel %vm195_vm0, %v838_v43, 0.0 }
 0x43c   : > { %v889_v50 = vadd.f32 %v888_v46, %v887_v47 }
 0x43d   : > { %v861_v45 = vpop.f32.mrf.mxu2 }
 0x43e   : > { %v890_v48 = vsel %vm195_vm0, %v861_v45, 0.0 }
 0x43f   : > { %v891_v51 = vadd.f32 %v890_v48, %v889_v50 }
 0x445   : > { %v884_v52 = vpop.f32.mrf.mxu3 }
 0x446   : > { %v892_v54 = vsel %vm195_vm0, %v884_v52, 0.0 }
 0x447   : > { %v893_v55 = vadd.f32 %v892_v54, %v891_v51 }
 0x449   : > { %v895_v56 = vadd.f32 %v894_v53, %v893_v55 }
 0x44b   : > { %v1471_v57 = vadd.f32 %v895_v56, %v1215_v0  ;;  %v925_v0 = vld [vmem:[%s1557_s3 + $0x10] sm:$0xff] }
 0x44c   : > { %960 = vmatpush.msra.mxu0 %v925_v0 }
 0x44d   : > { %v897_v58 = vsel %vm195_vm0, %v1471_v57, 0.0 }
 0x44e   : > { %898 = vadd.xlane.f32.xlu1 %v897_v58  ;;  %961 = vmatpush.msra.mxu0 %v924_v2 }
 0x450   : > { %962 = vmatpush.msra.mxu0 %v923_v3 }
 0x4c1   : > { %v899_v59 = vpop.xlane.xlu1 %898 }
 0x4c2   : > { %v900_v60 = vmul.f32 %v899_v59, %v1219_v8 }
 0x4c4   : > { %v901_v61 = vsub.f32 %v1471_v57, %v900_v60 }
 0x4c6   : > { %v902_v62 = vmul.f32 %v901_v61, %v901_v61 }
 0x4c8   : > { %v903_v63 = vsel %vm195_vm0, %v902_v62, 0.0 }
 0x4c9   : > { %904 = vadd.xlane.f32.xlu2 %v903_v63 }
 0x53c   : > { %v905_v7 = vpop.xlane.xlu2 %904 }
 0x53d   : > { %v906_v9 = vmul.f32 %v905_v7, %v1219_v8  ;;  %v936_v8 = vld [vmem:[%s1557_s3 + $0x68] sm:$0xff] }
 0x53e   : > { %975 = vmatpush.msra.mxu1 %v936_v8 }
 0x53f   : > { %v907_v11 = vadd.f32 1e-05, %v906_v9 }
 0x540   : > { %976 = vmatpush.msra.mxu1 %v935_v14 }
 0x541   : > { %1163 = vrsqrt.f32 %v907_v11  ;;  %vm914_vm7 = vweird.f32 %v907_v11 }
 0x542   : > { %977 = vmatpush.msra.mxu1 %v934_v16 }
 0x544   : > { %978 = vmatpush.msra.mxu1 %v933_v18 }
 0x546   : > { %979 = vmatpush.msra.mxu1 %v932_v20 }
 0x547   : > { %v1164_v15 = vpop.eup %1163 }
 0x548   : > { %v909_v17 = vmul.f32 %v1164_v15, %v907_v11  ;;  %vm915_vm6 = vweird.f32 %v1164_v15  ;;  %980 = vmatpush.msra.mxu1 %v931_v22 }
 0x549   : > { %vm916_vm8 = vmor %vm914_vm7, %vm915_vm6 }
 0x54a   : > { %v910_v19 = vmul.f32 %v1164_v15, %v909_v17  ;;  %981 = vmatpush.msra.mxu1 %v930_v24 }
 0x54c   : > { %v911_v21 = vmul.f32 0.5, %v910_v19  ;;  %982 = vmatpush.msra.mxu1 %v929_v32 }
 0x54e   : > { %v912_v23 = vsub.f32 1.5, %v911_v21  ;;  %983 = vmatpush.msra.mxu1 %v928_v33 }
 0x550   : > { %v913_v25 = vmul.f32 %v1164_v15, %v912_v23  ;;  %984 = vmatpush.msra.mxu1 %v927_v34 }
 0x552   : > { %v917_v27 = vsel %vm916_vm8, %v1164_v15, %v913_v25 }
 0x553   : > { %v918_v28 = vmul.f32 %v917_v27, %v901_v61 }
 0x555   : > { %v920_v30 = vmul.f32 %v919_v26, %v918_v28 }
 0x557   : > { %v922_v31 = vadd.f32 %v921_v29, %v920_v30 }
 0x559   : > { %1119 = vmatmul.msk.f32.vlgmr.msra.gmra.mxu0 %vm195_vm0, %v922_v31 }
 0x5d6   : > { %v964_v36 = vpop.f32.mrf.mxu0 }
 0x5d7   : > { %v965_v37 = vadd.f32 %v964_v36, %v943_v35 }
 0x5d9   : > { %v967_v38 = vmax.f32 %v965_v37, 0.0 }
 0x5db   : > { %985 = vmatmul.f32.vlgmr.msra.gmra.mxu1 %v967_v38 }
 0x658   : > { %v986_v40 = vpop.f32.mrf.mxu1 }
 0x659   : > { %v987_v41 = vadd.f32 %v986_v40, %v968_v39 }
 0x65b   : > { %v989_v42 = vadd.f32 %v987_v41, %v1471_v57 }
 0x65d   : > { %990 = vst.msk [vmem:[%s192_s6] sm:$0xff] %vm195_vm0, %v989_v42 }
 0x65e PF: > { %s14_s15 = sadd.s32 1, %s1171_s15  }
 0x65f   : > { %p11_p4 = scmp.ge.s32.totalorder %s14_s15, 4  }
 0x661   :  { %13 = sbr.rel (!%p11_p4) target bundleno = 1 (0x1), region = 68 }

</bundles_post_ra>
